<compile_context>
chip_gen: v5e
topology: v5e:2x2
jax: 0.10.0
libtpu: 0.0.40
codegen_flags: <defaults>
</compile_context>

<pallas_src>
import jax
import jax.numpy as jnp
from jax.experimental import pallas as pl
from jax.experimental.pallas import tpu as pltpu

# ----------------------------- model config ---------------------------------
D_MODEL = 32
D_FF = 64
BATCH = 2
SEQ = 8
LN_EPS = 1e-5


def feed_forward_kernel(
    x_ref, ln_g_ref, ln_b_ref, w1_ref, b1_ref, w2_ref, b2_ref, out_ref
):
    # Per-batch tile (batch dim squeezed by BlockSpec): x_ref / out_ref are (SEQ, D_MODEL).
    x = x_ref[...]

    # LayerNorm (biased variance, eps inside rsqrt — matches nn.LayerNorm).
    mean = jnp.mean(x, axis=-1, keepdims=True)
    var = jnp.mean((x - mean) ** 2, axis=-1, keepdims=True)
    xn = (x - mean) * jax.lax.rsqrt(var + LN_EPS)
    xn = xn * ln_g_ref[...] + ln_b_ref[...]

    # Linear(d_model -> d_ff) + ReLU  (weights pre-transposed to [in, out]).
    h = jnp.dot(xn, w1_ref[...], preferred_element_type=jnp.float32) + b1_ref[...]
    h = jnp.maximum(h, jnp.float32(0.0))

    # TODO(synk): nn.Dropout omitted (eval-mode identity).

    # Linear(d_ff -> d_model).
    out_ref[...] = (
        jnp.dot(h, w2_ref[...], preferred_element_type=jnp.float32) + b2_ref[...]
    )


@jax.jit
def feed_forward(x, params):
    B, L, D = x.shape

    def const2(shape):
        # Grid-invariant parameter block: same tile for every grid step.
        return pl.BlockSpec(shape, lambda b: (0, 0))

    in_specs = [
        pl.BlockSpec((None, L, D), lambda b: (b, 0, 0)),   # x  (per-batch tile)
        const2((1, D)), const2((1, D)),                    # LN gamma / beta
        const2((D, D_FF)), const2((1, D_FF)),              # W1, b1
        const2((D_FF, D)), const2((1, D)),                 # W2, b2
    ]
    out_specs = pl.BlockSpec((None, L, D), lambda b: (b, 0, 0))

    return pl.pallas_call(
        feed_forward_kernel,
        out_shape=jax.ShapeDtypeStruct((B, L, D), jnp.float32),
        grid_spec=pltpu.PrefetchScalarGridSpec(
            num_scalar_prefetch=0,
            grid=(B,),
            in_specs=in_specs,
            out_specs=out_specs,
        ),
        compiler_params=pltpu.CompilerParams(
            dimension_semantics=("parallel",),   # B=2 -> both v7x TensorCores
        ),
    )(
        x,
        params["ln_g"], params["ln_b"],
        params["w1"], params["b1"],
        params["w2"], params["b2"],
    )


def reference(x, params):
    # Pure-JAX reference matching the PyTorch forward (eval mode).
    m = jnp.mean(x, -1, keepdims=True)
    v = jnp.mean((x - m) ** 2, -1, keepdims=True)
    xn = (x - m) / jnp.sqrt(v + LN_EPS) * params["ln_g"] + params["ln_b"]
    h = jnp.maximum(xn @ params["w1"] + params["b1"], 0.0)
    return h @ params["w2"] + params["b2"]


def init_params(key):
    # Deterministic synthetic parameters (Linear weights stored pre-transposed
    # as [in, out]; PyTorch stores [out, in] and computes x @ W.T).
    ks = jax.random.split(key, 6)
    s = 0.05
    return {
        "ln_g": 1.0 + s * jax.random.normal(ks[0], (1, D_MODEL), jnp.float32),
        "ln_b": s * jax.random.normal(ks[1], (1, D_MODEL), jnp.float32),
        "w1": s * jax.random.normal(ks[2], (D_MODEL, D_FF), jnp.float32),
        "b1": s * jax.random.normal(ks[3], (1, D_FF), jnp.float32),
        "w2": s * jax.random.normal(ks[4], (D_FF, D_MODEL), jnp.float32),
        "b2": s * jax.random.normal(ks[5], (1, D_MODEL), jnp.float32),
    }


if __name__ == "__main__":
    key = jax.random.PRNGKey(0)
    kx, kp = jax.random.split(key, 2)
    x = jax.random.normal(kx, (BATCH, SEQ, D_MODEL), jnp.float32)
    params = init_params(kp)

    out = feed_forward(x, params)
    jax.block_until_ready(out)

    ref_out = reference(x, params)
    assert out.shape == (BATCH, SEQ, D_MODEL), "shape mismatch"
    assert jnp.allclose(out, ref_out, atol=1e-4, rtol=1e-4), "out mismatch"

    print("KERNEL_OK")
</pallas_src>

<mosaic_0001>
module attributes {stable_mosaic.version = 11 : i64} {
  func.func @feed_forward_kernel(%arg0: i32, %arg1: memref<1x8x32xf32, #tpu.memory_space<vmem>>, %arg2: memref<1x32xf32, #tpu.memory_space<vmem>>, %arg3: memref<1x32xf32, #tpu.memory_space<vmem>>, %arg4: memref<32x64xf32, #tpu.memory_space<vmem>>, %arg5: memref<1x64xf32, #tpu.memory_space<vmem>>, %arg6: memref<64x32xf32, #tpu.memory_space<vmem>>, %arg7: memref<1x32xf32, #tpu.memory_space<vmem>>, %arg8: memref<1x8x32xf32, #tpu.memory_space<vmem>>) attributes {dimension_semantics = [#tpu.dimension_semantics<parallel>], iteration_bounds = array<i64: 2>, scalar_prefetch = 0 : i64, scratch_operands = 0 : i64, tpu.core_type = #tpu.core_type<tc>, window_params = [{transform_indices = @transform_0, window_bounds = array<i64: 1, 8, 32>}, {pipeline_mode = #tpu.pipeline_mode<synchronous>, transform_indices = @transform_1, window_bounds = array<i64: 1, 32>}, {pipeline_mode = #tpu.pipeline_mode<synchronous>, transform_indices = @transform_2, window_bounds = array<i64: 1, 32>}, {pipeline_mode = #tpu.pipeline_mode<synchronous>, transform_indices = @transform_3, window_bounds = array<i64: 32, 64>}, {pipeline_mode = #tpu.pipeline_mode<synchronous>, transform_indices = @transform_4, window_bounds = array<i64: 1, 64>}, {pipeline_mode = #tpu.pipeline_mode<synchronous>, transform_indices = @transform_5, window_bounds = array<i64: 64, 32>}, {pipeline_mode = #tpu.pipeline_mode<synchronous>, transform_indices = @transform_6, window_bounds = array<i64: 1, 32>}, {transform_indices = @transform_7, window_bounds = array<i64: 1, 8, 32>}]} {
    %c0 = arith.constant 0 : index
    %c0_0 = arith.constant 0 : index
    %c0_1 = arith.constant 0 : index
    %0 = vector.load %arg1[%c0, %c0_0, %c0_1] : memref<1x8x32xf32, #tpu.memory_space<vmem>>, vector<1x8x32xf32>
    %1 = vector.shape_cast %0 : vector<1x8x32xf32> to vector<8x32xf32>
    %cst = arith.constant dense<0.000000e+00> : vector<8xf32>
    %2 = vector.multi_reduction <add>, %1, %cst [1] : vector<8x32xf32> to vector<8xf32>
    %3 = vector.shape_cast %2 : vector<8xf32> to vector<8x1xf32>
    %cst_2 = arith.constant 3.200000e+01 : f32
    %4 = vector.broadcast %cst_2 : f32 to vector<8x1xf32>
    %5 = arith.divf %3, %4 : vector<8x1xf32>
    %6 = vector.broadcast %5 : vector<8x1xf32> to vector<8x32xf32>
    %7 = arith.subf %1, %6 : vector<8x32xf32>
    %8 = arith.mulf %7, %7 : vector<8x32xf32>
    %cst_3 = arith.constant dense<0.000000e+00> : vector<8xf32>
    %9 = vector.multi_reduction <add>, %8, %cst_3 [1] : vector<8x32xf32> to vector<8xf32>
    %10 = vector.shape_cast %9 : vector<8xf32> to vector<8x1xf32>
    %cst_4 = arith.constant 3.200000e+01 : f32
    %11 = vector.broadcast %cst_4 : f32 to vector<8x1xf32>
    %12 = arith.divf %10, %11 : vector<8x1xf32>
    %13 = vector.broadcast %5 : vector<8x1xf32> to vector<8x32xf32>
    %14 = arith.subf %1, %13 : vector<8x32xf32>
    %cst_5 = arith.constant 9.99999974E-6 : f32
    %15 = vector.broadcast %cst_5 : f32 to vector<8x1xf32>
    %16 = arith.addf %12, %15 : vector<8x1xf32>
    %17 = math.rsqrt %16 : vector<8x1xf32>
    %18 = vector.broadcast %17 : vector<8x1xf32> to vector<8x32xf32>
    %19 = arith.mulf %14, %18 : vector<8x32xf32>
    %c0_6 = arith.constant 0 : index
    %c0_7 = arith.constant 0 : index
    %20 = vector.load %arg2[%c0_6, %c0_7] : memref<1x32xf32, #tpu.memory_space<vmem>>, vector<1x32xf32>
    %21 = vector.broadcast %20 : vector<1x32xf32> to vector<8x32xf32>
    %22 = arith.mulf %19, %21 : vector<8x32xf32>
    %c0_8 = arith.constant 0 : index
    %c0_9 = arith.constant 0 : index
    %23 = vector.load %arg3[%c0_8, %c0_9] : memref<1x32xf32, #tpu.memory_space<vmem>>, vector<1x32xf32>
    %24 = vector.broadcast %23 : vector<1x32xf32> to vector<8x32xf32>
    %25 = arith.addf %22, %24 : vector<8x32xf32>
    %c0_10 = arith.constant 0 : index
    %c0_11 = arith.constant 0 : index
    %26 = vector.load %arg4[%c0_10, %c0_11] : memref<32x64xf32, #tpu.memory_space<vmem>>, vector<32x64xf32>
    %cst_12 = arith.constant dense<0.000000e+00> : vector<8x64xf32>
    %27 = tpu.matmul %25, %26, %cst_12 {dimension_numbers = #tpu.dot_dimension_numbers<[1], [0], [0], [1], [0, 0, 1, 1], [], []>} : vector<8x32xf32>, vector<32x64xf32>, vector<8x64xf32> -> vector<8x64xf32>
    %c0_13 = arith.constant 0 : index
    %c0_14 = arith.constant 0 : index
    %28 = vector.load %arg5[%c0_13, %c0_14] : memref<1x64xf32, #tpu.memory_space<vmem>>, vector<1x64xf32>
    %29 = vector.broadcast %28 : vector<1x64xf32> to vector<8x64xf32>
    %30 = arith.addf %27, %29 : vector<8x64xf32>
    %cst_15 = arith.constant 0.000000e+00 : f32
    %31 = vector.broadcast %cst_15 : f32 to vector<8x64xf32>
    %32 = arith.maximumf %30, %31 : vector<8x64xf32>
    %c0_16 = arith.constant 0 : index
    %c0_17 = arith.constant 0 : index
    %33 = vector.load %arg6[%c0_16, %c0_17] : memref<64x32xf32, #tpu.memory_space<vmem>>, vector<64x32xf32>
    %cst_18 = arith.constant dense<0.000000e+00> : vector<8x32xf32>
    %34 = tpu.matmul %32, %33, %cst_18 {dimension_numbers = #tpu.dot_dimension_numbers<[1], [0], [0], [1], [0, 0, 1, 1], [], []>} : vector<8x64xf32>, vector<64x32xf32>, vector<8x32xf32> -> vector<8x32xf32>
    %c0_19 = arith.constant 0 : index
    %c0_20 = arith.constant 0 : index
    %35 = vector.load %arg7[%c0_19, %c0_20] : memref<1x32xf32, #tpu.memory_space<vmem>>, vector<1x32xf32>
    %36 = vector.broadcast %35 : vector<1x32xf32> to vector<8x32xf32>
    %37 = arith.addf %34, %36 : vector<8x32xf32>
    %c0_21 = arith.constant 0 : index
    %c0_22 = arith.constant 0 : index
    %c0_23 = arith.constant 0 : index
    %38 = vector.load %arg8[%c0_21, %c0_22, %c0_23] : memref<1x8x32xf32, #tpu.memory_space<vmem>>, vector<1x8x32xf32>
    %39 = vector.shape_cast %38 : vector<1x8x32xf32> to vector<8x32xf32>
    %40 = vector.shape_cast %37 : vector<8x32xf32> to vector<1x8x32xf32>
    tpu.vector_store %arg8[%c0_21, %c0_22, %c0_23], %40 {strides = array<i32>} : memref<1x8x32xf32, #tpu.memory_space<vmem>>, vector<1x8x32xf32>,
    return
  }
  func.func @transform_0(%arg0: i32) -> (i32, i32, i32) {
    %c0_i32 = arith.constant 0 : i32
    %c0_i32_0 = arith.constant 0 : i32
    %c0_i32_1 = arith.constant 0 : i32
    return %arg0, %c0_i32, %c0_i32_0 : i32, i32, i32
  }
  func.func @transform_1(%arg0: i32) -> (i32, i32) {
    %c0_i32 = arith.constant 0 : i32
    %c0_i32_0 = arith.constant 0 : i32
    %c0_i32_1 = arith.constant 0 : i32
    return %c0_i32, %c0_i32_0 : i32, i32
  }
  func.func @transform_2(%arg0: i32) -> (i32, i32) {
    %c0_i32 = arith.constant 0 : i32
    %c0_i32_0 = arith.constant 0 : i32
    %c0_i32_1 = arith.constant 0 : i32
    return %c0_i32, %c0_i32_0 : i32, i32
  }
  func.func @transform_3(%arg0: i32) -> (i32, i32) {
    %c0_i32 = arith.constant 0 : i32
    %c0_i32_0 = arith.constant 0 : i32
    %c0_i32_1 = arith.constant 0 : i32
    return %c0_i32, %c0_i32_0 : i32, i32
  }
  func.func @transform_4(%arg0: i32) -> (i32, i32) {
    %c0_i32 = arith.constant 0 : i32
    %c0_i32_0 = arith.constant 0 : i32
    %c0_i32_1 = arith.constant 0 : i32
    return %c0_i32, %c0_i32_0 : i32, i32
  }
  func.func @transform_5(%arg0: i32) -> (i32, i32) {
    %c0_i32 = arith.constant 0 : i32
    %c0_i32_0 = arith.constant 0 : i32
    %c0_i32_1 = arith.constant 0 : i32
    return %c0_i32, %c0_i32_0 : i32, i32
  }
  func.func @transform_6(%arg0: i32) -> (i32, i32) {
    %c0_i32 = arith.constant 0 : i32
    %c0_i32_0 = arith.constant 0 : i32
    %c0_i32_1 = arith.constant 0 : i32
    return %c0_i32, %c0_i32_0 : i32, i32
  }
  func.func @transform_7(%arg0: i32) -> (i32, i32, i32) {
    %c0_i32 = arith.constant 0 : i32
    %c0_i32_0 = arith.constant 0 : i32
    %c0_i32_1 = arith.constant 0 : i32
    return %arg0, %c0_i32, %c0_i32_0 : i32, i32, i32
  }
}

</mosaic_0001>

<bundles_post_ra>
// kernel: feed_forward.1
= control target key start
LH: loop header
LB: loop body
LE: loop exit
PB: predicated region body
PF: predicated region fallthrough
CT: control target
= control target key end

     0   :  { %12 = vsyncpa [#allocation3], 0  ;;  %s761_s0 = inlined_call_operand.vmem [shape: f32[2,8,32], index: 0, kind: input, shape index: {}]   ;;  %s762_s1 = inlined_call_operand.vmem [shape: f32[1,32], index: 1, kind: input, shape index: {}]   ;;  %s763_s2 = inlined_call_operand.vmem [shape: f32[1,32], index: 2, kind: input, shape index: {}]   ;;  %s764_s3 = inlined_call_operand.vmem [shape: f32[32,64], index: 3, kind: input, shape index: {}]   ;;  %s765_s4 = inlined_call_operand.vmem [shape: f32[1,64], index: 4, kind: input, shape index: {}]   ;;  %s766_s5 = inlined_call_operand.vmem [shape: f32[64,32], index: 5, kind: input, shape index: {}]   ;;  %s767_s6 = inlined_call_operand.vmem [shape: f32[1,32], index: 6, kind: input, shape index: {}]   ;;  %s768_s7 = inlined_call_operand.hbm [shape: f32[2,8,32], index: 7, kind: output, shape index: {}]  }
   0x1   :  { %14 = vsyncpa [#allocation3 + $0x1], 0  ;;  %s624_s24 = smov 0   ;;  %s626_s25 = smov 0  }
   0x2   :  { %s628_s26 = smov 0   ;;  %s630_s27 = smov 0  }
   0x3 LB: > { %s645_s28 = sadd.s32 4294967295, %s581_s27   ;;  %s459_s29 = sadd.s32 4294967294, %s581_s27   ;;  %s581_s27 = sphi %s630_s27, %s774_s27   ;;  %s577_s26 = sphi %s628_s26, %s773_s26   ;;  %s573_s25 = sphi %s626_s25, %s772_s25   ;;  %s569_s24 = sphi %s624_s24, %s771_s24  }
   0x4   : > { %s649_s30 = sadd.s32 1, %s581_s27   ;;  %s179_s8 = sadd.s32 1, %s577_s26 }
   0x5   : > { %s176_s9 = ssub.s32 %s581_s27, %s649_s30  ;;  %p189_p0 = scmp.ne.s32.totalorder %s577_s26, %s573_s25 }
   0x6   : > { %p177_p1 = scmp.eq.s32.totalorder %s176_s9, 0  ;;  %p190_p2 = scmp.eq.s32.totalorder %s645_s28, 1 }
   0x7   : > { %p195_p3 = scmp.ne.s32.totalorder %s573_s25, %s569_s24  ;;  %p196_p4 = scmp.eq.s32.totalorder %s459_s29, 1 }
   0x8   : > { %s660_s10 = scalar_select %p177_p1, %s577_s26, %s179_s8  }
   0x9   : > { %p662_p5 = por %p190_p2, %p189_p0  ;;  %p666_p6 = por %p196_p4, %p195_p3 }
   0xa   : > { %p462_p7 = scmp.ge.s32.totalorder %s581_s27, 1  ;;  %p239_p8 = scmp.lt.s32.totalorder %s581_s27, 3 }
   0xc   : > { %p240_p9 = pnand %p462_p7, %p239_p8 }
   0xd   : > { %p270_p10 = scmp.lt.s32.totalorder (!%p240_p9), %s645_s28, 1  ;;  %s267_s20 = sand.u32 (!%p240_p9), 1, %s573_s25  }
   0xe   : > { %243 = sbr.rel (%p240_p9) target bundleno = 553 (0x229), region = 48  ;;  %s463_s21 = sshll.u32 (!%p240_p9), %s267_s20, 3 }
   0xf   : > { %s468_s22 = sshll.u32 (!%p240_p9), %s645_s28, 3 }
  0x10   : > { %s395_s8 = scalar_lea.hbm (!%p240_p9), %s768_s7, %s468_s22 }
  0x11   : > { %s399_s16 = sshll.u32 (!%p240_p9), %s395_s8, 4  ;;  %s400_s16 = int_to_ptr.hbm [resolvable:$true] %s399_s16 }
  0x13   : > { %s271_s13 = scalar_select %p270_p10, %s645_s28, 1  ;;  %vm275_vm0 = vcmask 261120   ;;  %v583_v2 = vmov 32.0   ;;  %v318_v14 = vld [vmem:[%s764_s3 + $0x18] sm:$0xff]  ;;  %v317_v15 = vld [vmem:[%s764_s3 + $0x10] sm:$0xff]  ;;  %v316_v16 = vld [vmem:[%s764_s3 + $0x8] sm:$0xff] }
  0x14   : > { %515 = vrcp.f32 %v583_v2  ;;  %338 = vmatpush.msra.mxu0 %v318_v14  ;;  %v315_v17 = vld [vmem:[%s764_s3] sm:$0xff]  ;;  %v354_v18 = vld [vmem:[%s766_s5 + $0x38] sm:$0xff]  ;;  %v353_v19 = vld [vmem:[%s766_s5 + $0x30] sm:$0xff]  ;;  %vm359_vm5 = vcmask 523264   ;;  %s533_s28 = sshra.s32 %s400_s16, 4  ;;  %s534_s28 = int_to_ptr.hbm [resolvable:$true] %s533_s28 }
  0x15   : > { %s464_s14 = sshll.u32 %s271_s13, 3  ;;  %371 = vmatpush.msra.mxu1 %v354_v18  ;;  %v352_v20 = vld [vmem:[%s766_s5 + $0x28] sm:$0xff]  ;;  %v351_v23 = vld [vmem:[%s766_s5 + $0x20] sm:$0xff]  ;;  %v350_v25 = vld [vmem:[%s766_s5 + $0x18] sm:$0xff]  ;;  %s535_s18 = scalar_lea.hbm %s534_s28, 8 }
  0x16   : > { %s273_s17 = scalar_lea.vmem %s761_s0, %s464_s14  ;;  %339 = vmatpush.msra.mxu0 %v317_v15  ;;  %v511_v32 = vld [vmem:[%s762_s1] ss:$0 sm:$0xff]  ;;  %v349_v38 = vld [vmem:[%s766_s5 + $0x10] sm:$0xff]  ;;  %v348_v39 = vld [vmem:[%s766_s5 + $0x8] sm:$0xff]  ;;  %s269_s14 = scalar_lea.vmem [#allocation2], %s463_s21 }
  0x17   : > { %v274_v0 = vld [vmem:[%s273_s17] sm:$0xff]  ;;  %372 = vmatpush.msra.mxu1 %v353_v19  ;;  %s397_s15 = sshll.u32 %s269_s14, 4  ;;  %s385_s17 = scalar_lea.sflag [#allocation3], %s267_s20  ;;  %s398_s15 = int_to_ptr.vmem [resolvable:$true] %s397_s15 }
  0x18   : > { %v276_v1 = vsel %vm275_vm0, %v274_v0, 0.0  ;;  %340 = vmatpush.msra.mxu0 %v316_v16  ;;  %v512_v35 = vld [vmem:[%s763_s2] ss:$0 sm:$0xff]  ;;  %p536_p11 = scmp.ne.s32.totalorder %s534_s28, %s535_s18  ;;  %s539_s21 = scalar_lea.hbm %s768_s7, 16 }
  0x19   : > { %277 = vadd.xlane.f32.xlu0 %v276_v1  ;;  %373 = vmatpush.msra.mxu1 %v352_v20  ;;  %v347_v40 = vld [vmem:[%s766_s5] sm:$0xff]  ;;  %p540_p0 = scmp.lt.s32.totalorder %s534_s28, %s768_s7  ;;  %p541_p1 = scmp.lt.s32.totalorder %s539_s21, %s535_s18 }
  0x1a   : > { %v516_v3 = vpop.eup %515  ;;  %341 = vmatpush.msra.mxu0 %v315_v17  ;;  %v513_v41 = vld [vmem:[%s765_s4] ss:$0 sm:$0xff]  ;;  %p537_p12 = pnand %p536_p11, %p662_p5 }
  0x1b   : > { %v280_v4 = vmul.f32 32.0, %v516_v3  ;;  %vm284_vm1 = vweird.f32 %v516_v3  ;;  %374 = vmatpush.msra.mxu1 %v351_v23  ;;  %v514_v45 = vld [vmem:[%s767_s6] ss:$0 sm:$0xff]  ;;  %p542_p2 = por %p541_p1, %p540_p0 }
  0x1c   : > { %p538_p13 = pneg %p537_p12 }
  0x1d   : > { %v281_v5 = vsub.f32 1.0, %v280_v4  ;;  %375 = vmatpush.msra.mxu1 %v350_v25 }
  0x1e   : > { %p543_p3 = pnand %p542_p2, %p538_p13 }
  0x1f   : > { %v282_v6 = vmul.f32 %v516_v3, %v281_v5  ;;  %376 = vmatpush.msra.mxu1 %v349_v38 }
  0x21   : > { %v283_v7 = vadd.f32 %v516_v3, %v282_v6  ;;  %377 = vmatpush.msra.mxu1 %v348_v39 }
  0x23   : > { %v285_v8 = vsel %vm284_vm1, %v516_v3, %v283_v7  ;;  %378 = vmatpush.msra.mxu1 %v347_v40 }
  0x8c   : > { %v278_v9 = vpop.xlane.xlu0 %277 }
  0x8d   : > { %v286_v10 = vmul.f32 %v285_v8, %v278_v9 }
  0x8f   : > { %v287_v11 = vsub.f32 %v274_v0, %v286_v10 }
  0x91   : > { %v288_v12 = vmul.f32 %v287_v11, %v287_v11 }
  0x93   : > { %v289_v13 = vsel %vm275_vm0, %v288_v12, 0.0 }
  0x94   : > { %290 = vadd.xlane.f32.xlu0 %v289_v13 }
 0x107   : > { %v291_v21 = vpop.xlane.xlu0 %290 }
 0x108   : > { %v292_v22 = vmul.f32 %v291_v21, %v285_v8 }
 0x10a   : > { %v293_v24 = vadd.f32 1e-05, %v292_v22 }
 0x10c   : > { %517 = vrsqrt.f32 %v293_v24  ;;  %vm300_vm3 = vweird.f32 %v293_v24 }
 0x112   : > { %v518_v26 = vpop.eup %517 }
 0x113   : > { %v295_v27 = vmul.f32 %v518_v26, %v293_v24  ;;  %vm301_vm2 = vweird.f32 %v518_v26 }
 0x114   : > { %vm302_vm4 = vmor %vm300_vm3, %vm301_vm2 }
 0x115   : > { %v296_v28 = vmul.f32 %v518_v26, %v295_v27 }
 0x117   : > { %v297_v29 = vmul.f32 0.5, %v296_v28 }
 0x119   : > { %v298_v30 = vsub.f32 1.5, %v297_v29 }
 0x11b   : > { %v299_v31 = vmul.f32 %v518_v26, %v298_v30 }
 0x11d   : > { %v303_v33 = vsel %vm302_vm4, %v518_v26, %v299_v31 }
 0x11e   : > { %v304_v34 = vmul.f32 %v303_v33, %v287_v11 }
 0x120   : > { %v309_v36 = vmul.f32 %v511_v32, %v304_v34 }
 0x122   : > { %v314_v37 = vadd.f32 %v512_v35, %v309_v36 }
 0x124   : > { %465 = vmatmul.msk.f32.vlgmr.msra.gmra.mxu0 %vm275_vm0, %v314_v37 }
 0x1a1   : > { %v343_v42 = vpop.f32.mrf.mxu0 }
 0x1a2   : > { %v344_v43 = vadd.f32 %v513_v41, %v343_v42 }
 0x1a4   : > { %v346_v44 = vmax.f32 %v344_v43, 0.0 }
 0x1a6   : > { %466 = vmatmul.msk.f32.vlgmr.msra.gmra.mxu1 %vm359_vm5, %v346_v44 }
 0x223   : > { %v380_v46 = vpop.f32.mrf.mxu1 }
 0x224   : > { %v381_v47 = vadd.f32 %v514_v45, %v380_v46 }
 0x226   : > { %383 = vst.msk [vmem:[%s269_s14] sm:$0xff] %vm275_vm0, %v381_v47 }
 0x227   : > { %546 = shalt.err (!%p543_p3)
}
 0x228   : > { %471 = dma.vmem_to_hbm [thread:$0]  (%p662_p5), %s398_s15, 128, %s400_s16, %s385_s17  }
 0x229 PF: > { %p477_p4 = scmp.ge.s32.totalorder %s581_s27, 2  ;;  %s411_s20 = sand.u32 1, %s569_s24  }
 0x22a   : > { %s412_s8 = scalar_lea.sflag [#allocation3], %s411_s20 }
 0x22b   : > { %p474_p7 = pnand %p477_p4, %p666_p6 }
 0x22d   : > { %p475_p8 = pneg %p474_p7 }
 0x22f   : > { %564 = dma.done.wait (%p475_p8), %s412_s8, 128  }
 0x230   : > { %566 = vsyncadd (%p475_p8), %s412_s8, 4294967168  ;;  %p17_p9 = scmp.ge.s32.totalorder %s649_s30, 4   ;;  %s771_s24 = smov %s573_s25 }
 0x231   : > { %s772_s25 = smov %s577_s26  ;;  %s773_s26 = smov %s660_s10 }
 0x232   : > { %s774_s27 = smov %s649_s30  ;;  %19 = sbr.rel (!%p17_p9) target bundleno = 3 (0x3), region = 83 }
 0x237   :  { %418 = vsyncpa [#allocation3], 1 }
 0x238   :  { %420 = vsyncpa [#allocation3 + $0x1], 1 }

</bundles_post_ra>
